<compile_context>
chip_gen: v5e
topology: v5e:2x2
jax: 0.10.0
libtpu: 0.0.40
codegen_flags: <defaults>
</compile_context>

<pallas_src>
import math
import functools

import jax
import jax.numpy as jnp
from jax.experimental import pallas as pl
from jax.experimental.pallas import tpu as pltpu


# 48 MiB scoped VMEM: above the per-generation defaults, below v7x's 64 MiB
# physical VMEM, and comfortably holds the double-buffered (1024, 2048) bf16
# A tiles plus the small [tile, D] operands.
_VMEM_LIMIT = 48 * 1024 * 1024


def _tile_size(n, target, align=128):
    """Largest `align`-multiple divisor of n that is <= target, else full n."""
    if n <= target:
        return n
    t = (target // align) * align
    while t >= align:
        if n % t == 0:
            return t
        t -= align
    # No aligned divisor: fall back to one full-extent block.  For very large
    # non-128-aligned per-graph n, pad n to a multiple of 128 upstream.
    return n


# ------------------- fused X projection:  P = X @ [W | w_rel | w_root] -------------------

def _proj_kernel(x_ref, w_ref, dinv_ref, pbf_ref, pf_ref, *, d):
    # P = X @ [W | w_rel | w_root]; the first d columns (the GCN term) are
    # pre-scaled by D^-1/2 so the A pass only needs the row-side scaling.
    p = jnp.dot(x_ref[...], w_ref[...], preferred_element_type=jnp.float32)
    col = jax.lax.broadcasted_iota(jnp.int32, p.shape, 1)
    ps = jnp.where(col < d, dinv_ref[...] * p, p)
    pf_ref[...] = ps                              # f32 copy (self-loop / root)
    pbf_ref[...] = ps.astype(jnp.bfloat16)        # bf16 MXU operand for A pass


def fused_projection(x, w_cat, d_inv, *, tm=512):
    n, din = x.shape
    dc = w_cat.shape[1]                           # d + 2
    d = dc - 2
    tm_ = _tile_size(n, tm, align=8)
    grid = (n // tm_,)
    return pl.pallas_call(
        functools.partial(_proj_kernel, d=d),
        grid=grid,
        in_specs=[
            pl.BlockSpec((tm_, din), lambda i: (i, 0)),
            pl.BlockSpec((din, dc), lambda i: (0, 0)),
            pl.BlockSpec((tm_, 1), lambda i: (i, 0)),
        ],
        out_specs=(pl.BlockSpec((tm_, dc), lambda i: (i, 0)),
                   pl.BlockSpec((tm_, dc), lambda i: (i, 0))),
        out_shape=(jax.ShapeDtypeStruct((n, dc), jnp.bfloat16),
                   jax.ShapeDtypeStruct((n, dc), jnp.float32)),
        compiler_params=pltpu.CompilerParams(
            dimension_semantics=("parallel",),
            vmem_limit_bytes=_VMEM_LIMIT),
    )(x, w_cat, d_inv)


# --------------- fused per-graph GCNConv+ReLU and SAGPooling score (one A pass) ---------------

def _gcn_sag_kernel(a_ref, psu_ref, psf_ref, dinv_ref, b_ref, h_ref, s_ref,
                    acc_ref, *, d):
    # a_ref   : (1, tm, tk)   bf16  per-graph adjacency tile
    # psu_ref : (1, tk, d+2)  bf16  [D^-1/2 XW | X w_rel | X w_root] (K rows)
    # psf_ref : (1, tm, d+2)  f32   same, row slice (self-loop + root terms)
    # dinv_ref: (1, tm, 1)    f32   D^-1/2 row slice
    # b_ref   : (1, 1, d+1)   f32   [gcn bias | b_rel]
    # h_ref   : (1, tm, d)    f32   relu(GCNConv) output
    # s_ref   : (1, tm, 1)    f32   tanh(GraphConv score) output
    # acc_ref : (tm, d+2)     f32   accumulator (col d = score aggregation)
    k = pl.program_id(2)

    @pl.when(k == 0)
    def _init():
        acc_ref[...] = jnp.zeros_like(acc_ref)

    # bf16 x bf16 -> f32 on the MXU; the extra score column rides along free.
    acc_ref[...] += jnp.dot(a_ref[0], psu_ref[0],
                            preferred_element_type=jnp.float32)

    @pl.when(k == pl.num_programs(2) - 1)
    def _finalize():
        acc = acc_ref[...]
        psf = psf_ref[0]
        bb = b_ref[0]
        dinv = dinv_ref[0]
        # GCN: relu( D^-1/2 (A Ys + Ys_self) + b ),  Ys = D^-1/2 X W
        gcn = dinv * (acc[:, :d] + psf[:, :d]) + bb[:, :d]
        h_ref[0] = jnp.maximum(gcn, 0.0)
        # score: tanh( A (X w_rel) + X w_root + b_rel )
        s_ref[0] = jnp.tanh(acc[:, d:d + 1] + psf[:, d + 1:d + 2]
                            + bb[:, d:d + 1])


def gcn_sag_layer(adj_g, x, w, b, w_rel, b_rel, w_root, *, tm=1024, tk=2048):
    """One layer: PyG GCNConv + ReLU and the SAGPooling GraphConv score.

    adj_g: [G, n, n] bf16, symmetric 0/1, no self loops (block-diag batch).
    Returns h [G*n, d] f32 and score [G, n, 1] f32.
    """
    g, n, _ = adj_g.shape
    d = w.shape[1]
    num_nodes = g * n

    # degree with self loop; per-graph blocks => G*n^2, not N^2 (plain JAX glue)
    deg = jnp.sum(adj_g.astype(jnp.float32), axis=2) + 1.0          # [G, n]
    d_inv = jax.lax.rsqrt(deg).reshape(num_nodes, 1)                # f32 [N,1]

    w_cat = jnp.concatenate([w, w_rel, w_root], axis=1)             # [d, d+2]
    ps_bf, ps_f = fused_projection(x, w_cat, d_inv)                 # [N, d+2]
    ps_bf = ps_bf.reshape(g, n, d + 2)
    ps_f = ps_f.reshape(g, n, d + 2)
    dinv_g = d_inv.reshape(g, n, 1)
    bias2 = jnp.concatenate([b, b_rel]).reshape(1, 1, d + 1)        # [b | b_rel]

    tm_ = _tile_size(n, tm)
    tk_ = _tile_size(n, tk)
    grid = (g, n // tm_, n // tk_)                                  # K last

    h, s = pl.pallas_call(
        functools.partial(_gcn_sag_kernel, d=d),
        grid=grid,
        in_specs=[
            pl.BlockSpec((1, tm_, tk_), lambda gi, i, k: (gi, i, k)),     # A
            pl.BlockSpec((1, tk_, d + 2), lambda gi, i, k: (gi, k, 0)),   # P bf16
            pl.BlockSpec((1, tm_, d + 2), lambda gi, i, k: (gi, i, 0)),   # P f32
            pl.BlockSpec((1, tm_, 1), lambda gi, i, k: (gi, i, 0)),       # D^-1/2
            pl.BlockSpec((1, 1, d + 1), lambda gi, i, k: (0, 0, 0)),      # biases
        ],
        out_specs=(pl.BlockSpec((1, tm_, d), lambda gi, i, k: (gi, i, 0)),
                   pl.BlockSpec((1, tm_, 1), lambda gi, i, k: (gi, i, 0))),
        out_shape=(jax.ShapeDtypeStruct((g, n, d), jnp.float32),
                   jax.ShapeDtypeStruct((g, n, 1), jnp.float32)),
        scratch_shapes=[pltpu.VMEM((tm_, d + 2), jnp.float32)],
        compiler_params=pltpu.CompilerParams(
            dimension_semantics=("parallel", "parallel", "arbitrary"),
            vmem_limit_bytes=_VMEM_LIMIT),
    )(adj_g, ps_bf, ps_f, dinv_g, bias2)
    return h.reshape(num_nodes, d), s


# ----------------------------- readout (gmp || gap) -----------------------------

def _readout_kernel(x_ref, mx_ref, mn_ref):
    # torch.cat([gmp(x, batch), gap(x, batch)], dim=1), one graph per grid step
    x = x_ref[0]                                     # [n, D]
    mx_ref[0] = jnp.max(x, axis=0, keepdims=True)    # global max pool
    mn_ref[0] = jnp.mean(x, axis=0, keepdims=True)   # global mean pool


def readout(h, g):
    n = h.shape[0] // g
    d = h.shape[1]
    xg = h.reshape(g, n, d)
    xmax, xmean = pl.pallas_call(
        _readout_kernel,
        grid=(g,),
        in_specs=[pl.BlockSpec((1, n, d), lambda i: (i, 0, 0))],
        out_specs=(pl.BlockSpec((1, 1, d), lambda i: (i, 0, 0)),
                   pl.BlockSpec((1, 1, d), lambda i: (i, 0, 0))),
        out_shape=(jax.ShapeDtypeStruct((g, 1, d), jnp.float32),
                   jax.ShapeDtypeStruct((g, 1, d), jnp.float32)),
        compiler_params=pltpu.CompilerParams(
            dimension_semantics=("parallel",),
            vmem_limit_bytes=_VMEM_LIMIT),
    )(xg)
    return jnp.concatenate([xmax.reshape(g, d), xmean.reshape(g, d)], axis=-1)


# --------------------- fused head: lin1 -> relu -> lin2 -> relu -> pred ---------------------

def _head_kernel(z_ref, w1_ref, b1_ref, w2_ref, b2_ref, wp_ref, bp_ref, o_ref):
    z = jnp.dot(z_ref[...], w1_ref[...],
                preferred_element_type=jnp.float32) + b1_ref[...]
    z = jnp.maximum(z, 0.0)
    # F.dropout(p=dropout_ratio, training=self.training): eval mode => identity
    z = jnp.dot(z, w2_ref[...], preferred_element_type=jnp.float32) + b2_ref[...]
    z = jnp.maximum(z, 0.0)
    o_ref[...] = jnp.dot(z, wp_ref[...],
                         preferred_element_type=jnp.float32) + bp_ref[...]


def head(z, w1, b1, w2, b2, wp, bp):
    g = z.shape[0]
    lv = wp.shape[1]
    return pl.pallas_call(
        _head_kernel,
        out_shape=jax.ShapeDtypeStruct((g, lv), jnp.float32),
        compiler_params=pltpu.CompilerParams(vmem_limit_bytes=_VMEM_LIMIT),
    )(z, w1, b1.reshape(1, -1), w2, b2.reshape(1, -1), wp, bp.reshape(1, -1))


# ------------------------------- glue (plain JAX) --------------------------------

def sag_pool(h, adj_g, score, ratio):
    """SAGPooling top-k + filter_adj on per-graph blocks (G*n*k gathers)."""
    g, n, _ = adj_g.shape
    d = h.shape[1]
    k = math.ceil(ratio * n)
    s = score.reshape(g, n)                                         # tanh(score)
    _, topi = jax.lax.top_k(s, k)                                   # per graph
    h_g = h.reshape(g, n, d)
    s_sel = jnp.take_along_axis(s, topi, axis=1)                    # [G, k]
    h_new = jnp.take_along_axis(h_g, topi[:, :, None], axis=1) * s_sel[:, :, None]
    a_rows = jnp.take_along_axis(adj_g, topi[:, :, None], axis=1)   # [G, k, n]
    a_new = jnp.take_along_axis(a_rows, topi[:, None, :], axis=2)   # [G, k, k]
    # TODO(synk): fuse this per-graph row/col gather (filter_adj) into the next
    # layer's A pass via PrefetchScalarGridSpec row indices to stay in-pipeline.
    return h_new.reshape(g * k, d), a_new, k


def init_params(key, emb_dim, num_vocab, max_seq_len, num_layers,
                num_nodetypes, num_nodeattrs, max_depth):
    keys = iter(jax.random.split(key, 64))

    def dense(shape, scale=0.1):
        return scale * jax.random.normal(next(keys), shape, dtype=jnp.float32)

    p = {
        "type_emb": dense((num_nodetypes, emb_dim)),
        "attr_emb": dense((num_nodeattrs, emb_dim)),
        "depth_emb": dense((max_depth + 1, emb_dim)),
        "convs": [], "pools": [],
        "lin1_w": dense((2 * emb_dim, emb_dim)), "lin1_b": dense((emb_dim,)),
        "lin2_w": dense((emb_dim, emb_dim)), "lin2_b": dense((emb_dim,)),
        "pred_w": dense((max_seq_len, emb_dim, num_vocab)),
        "pred_b": dense((max_seq_len, 1, num_vocab)),
    }
    for _ in range(num_layers):  # conv1 + convs[], pool1 + pools[]
        p["convs"].append({"w": dense((emb_dim, emb_dim)), "b": dense((emb_dim,))})
        p["pools"].append({"w_rel": dense((emb_dim, 1)), "b_rel": dense((1,)),
                           "w_root": dense((emb_dim, 1))})
    return p


def sagpool_gnn_forward(params, x_feat, node_depth, adj_g,
                        pooling_ratio=0.5, max_depth=20):
    # node_encoder (ASTNodeEncoder): embedding-table gathers; plain JAX glue.
    depth = jnp.minimum(node_depth.reshape(-1), max_depth)
    h = (params["type_emb"][x_feat[:, 0]]
         + params["attr_emb"][x_feat[:, 1]]
         + params["depth_emb"][depth])

    # 0/1 adjacency is exact in bf16 and feeds the MXU directly.
    # TODO(synk): store A as int8 (v5e/v6e) or fp8 e4m3 (v7x) in HBM and
    # upcast in-kernel for another 2x cut of the dominant A stream.
    a = adj_g.astype(jnp.bfloat16)                     # [G, n, n]
    g = a.shape[0]

    xs = []
    for i in range(len(params["convs"])):
        cp, pp = params["convs"][i], params["pools"][i]
        h, s = gcn_sag_layer(a, h, cp["w"], cp["b"],
                             pp["w_rel"], pp["b_rel"], pp["w_root"])
        h, a, _ = sag_pool(h, a, s, pooling_ratio)
        xs.append(readout(h, g))

    z = xs[0]
    for i in range(1, len(xs)):
        z = z + xs[i]

    # Fused prediction heads: one lane-dense [G, L*V] matmul, then split.
    num_heads, d, v = params["pred_w"].shape
    wp = jnp.transpose(params["pred_w"], (1, 0, 2)).reshape(d, num_heads * v)
    bp = params["pred_b"].reshape(num_heads * v)
    preds = head(z, params["lin1_w"], params["lin1_b"],
                 params["lin2_w"], params["lin2_b"], wp, bp)       # [G, L*V]
    return [preds[:, i * v:(i + 1) * v] for i in range(num_heads)]


# --------------------------------- main ------------------------------------

if __name__ == "__main__":
    emb_dim = 32
    num_vocab = 8
    max_seq_len = 4
    num_layers = 3
    num_graphs = 2
    n_per_graph = 16
    num_nodetypes, num_nodeattrs, max_depth = 10, 10, 20

    key = jax.random.PRNGKey(0)
    k_param, k_feat, k_depth, k_adj = jax.random.split(key, 4)

    params = init_params(k_param, emb_dim, num_vocab, max_seq_len, num_layers,
                         num_nodetypes, num_nodeattrs, max_depth)

    N = num_graphs * n_per_graph
    x_feat = jax.random.randint(k_feat, (N, 2), 0, num_nodetypes)       # [N, 2]
    node_depth = jax.random.randint(k_depth, (N, 1), 0, max_depth + 3)  # [N, 1]

    # block-diagonal batch stored per graph: [G, n, n], symmetric 0/1, no self loops
    a = (jax.random.uniform(k_adj, (num_graphs, n_per_graph, n_per_graph)) < 0.3)
    a = jnp.triu(a.astype(jnp.float32), 1)
    adj_g = a + jnp.swapaxes(a, 1, 2)

    out = sagpool_gnn_forward(params, x_feat, node_depth, adj_g,
                              pooling_ratio=0.5, max_depth=max_depth)
    jax.block_until_ready(out)
    assert len(out) == max_seq_len
    assert all(o.shape == (num_graphs, num_vocab) for o in out)
    print("KERNEL_OK")
</pallas_src>

<mosaic_0001>
module attributes {stable_mosaic.version = 11 : i64} {
  func.func @_proj_kernel(%arg0: i32, %arg1: memref<32x32xf32, #tpu.memory_space<vmem>>, %arg2: memref<32x34xf32, #tpu.memory_space<vmem>>, %arg3: memref<32x1xf32, #tpu.memory_space<vmem>>, %arg4: memref<32x34xbf16, #tpu.memory_space<vmem>>, %arg5: memref<32x34xf32, #tpu.memory_space<vmem>>) attributes {dimension_semantics = [#tpu.dimension_semantics<parallel>], iteration_bounds = array<i64: 1>, scalar_prefetch = 0 : i64, scratch_operands = 0 : i64, tpu.core_type = #tpu.core_type<tc>, window_params = [{transform_indices = @transform_0, window_bounds = array<i64: 32, 32>}, {pipeline_mode = #tpu.pipeline_mode<synchronous>, transform_indices = @transform_1, window_bounds = array<i64: 32, 34>}, {transform_indices = @transform_2, window_bounds = array<i64: 32, 1>}, {transform_indices = @transform_3, window_bounds = array<i64: 32, 34>}, {transform_indices = @transform_4, window_bounds = array<i64: 32, 34>}]} {
    %c0 = arith.constant 0 : index
    %c0_0 = arith.constant 0 : index
    %0 = vector.load %arg1[%c0, %c0_0] : memref<32x32xf32, #tpu.memory_space<vmem>>, vector<32x32xf32>
    %c0_1 = arith.constant 0 : index
    %c0_2 = arith.constant 0 : index
    %1 = vector.load %arg2[%c0_1, %c0_2] : memref<32x34xf32, #tpu.memory_space<vmem>>, vector<32x34xf32>
    %cst = arith.constant dense<0.000000e+00> : vector<32x34xf32>
    %2 = tpu.matmul %0, %1, %cst {dimension_numbers = #tpu.dot_dimension_numbers<[1], [0], [0], [1], [0, 0, 1, 1], [], []>} : vector<32x32xf32>, vector<32x34xf32>, vector<32x34xf32> -> vector<32x34xf32>
    %3 = tpu.iota {dimensions = array<i32: 1>} : vector<32x34xi32>
    %c32_i32 = arith.constant 32 : i32
    %4 = vector.broadcast %c32_i32 : i32 to vector<32x34xi32>
    %5 = arith.cmpi slt, %3, %4 : vector<32x34xi32>
    %c0_3 = arith.constant 0 : index
    %c0_4 = arith.constant 0 : index
    %6 = vector.load %arg3[%c0_3, %c0_4] : memref<32x1xf32, #tpu.memory_space<vmem>>, vector<32x1xf32>
    %7 = vector.broadcast %6 : vector<32x1xf32> to vector<32x34xf32>
    %8 = arith.mulf %7, %2 : vector<32x34xf32>
    %9 = arith.select %5, %8, %2 : vector<32x34xi1>, vector<32x34xf32>
    %c0_5 = arith.constant 0 : index
    %c0_6 = arith.constant 0 : index
    %10 = vector.load %arg5[%c0_5, %c0_6] : memref<32x34xf32, #tpu.memory_space<vmem>>, vector<32x34xf32>
    tpu.vector_store %arg5[%c0_5, %c0_6], %9 {strides = array<i32>} : memref<32x34xf32, #tpu.memory_space<vmem>>, vector<32x34xf32>,
    %11 = arith.truncf %9 : vector<32x34xf32> to vector<32x34xbf16>
    %c0_7 = arith.constant 0 : index
    %c0_8 = arith.constant 0 : index
    %12 = vector.load %arg4[%c0_7, %c0_8] : memref<32x34xbf16, #tpu.memory_space<vmem>>, vector<32x34xbf16>
    tpu.vector_store %arg4[%c0_7, %c0_8], %11 {strides = array<i32>} : memref<32x34xbf16, #tpu.memory_space<vmem>>, vector<32x34xbf16>,
    return
  }
  func.func @transform_0(%arg0: i32) -> (i32, i32) {
    %c0_i32 = arith.constant 0 : i32
    %c0_i32_0 = arith.constant 0 : i32
    return %arg0, %c0_i32 : i32, i32
  }
  func.func @transform_1(%arg0: i32) -> (i32, i32) {
    %c0_i32 = arith.constant 0 : i32
    %c0_i32_0 = arith.constant 0 : i32
    %c0_i32_1 = arith.constant 0 : i32
    return %c0_i32, %c0_i32_0 : i32, i32
  }
  func.func @transform_2(%arg0: i32) -> (i32, i32) {
    %c0_i32 = arith.constant 0 : i32
    %c0_i32_0 = arith.constant 0 : i32
    return %arg0, %c0_i32 : i32, i32
  }
  func.func @transform_3(%arg0: i32) -> (i32, i32) {
    %c0_i32 = arith.constant 0 : i32
    %c0_i32_0 = arith.constant 0 : i32
    return %arg0, %c0_i32 : i32, i32
  }
  func.func @transform_4(%arg0: i32) -> (i32, i32) {
    %c0_i32 = arith.constant 0 : i32
    %c0_i32_0 = arith.constant 0 : i32
    return %arg0, %c0_i32 : i32, i32
  }
}

</mosaic_0001>

<bundles_post_ra>
// kernel: tpu_custom_call.1
= control target key start
LH: loop header
LB: loop body
LE: loop exit
PB: predicated region body
PF: predicated region fallthrough
CT: control target
= control target key end

     0   :  { %10 = vsyncpa [#allocation3], 0  ;;  %s358_s0 = inlined_call_operand.vmem [shape: f32[32,32], index: 0, kind: input, shape index: {}]   ;;  %s359_s1 = inlined_call_operand.hbm [shape: f32[32,34], index: 1, kind: input, shape index: {}]   ;;  %s360_s2 = inlined_call_operand.vmem [shape: f32[32,1], index: 2, kind: input, shape index: {}]   ;;  %s361_s3 = inlined_call_operand.hbm [shape: bf16[32,34], index: 3, kind: output, shape index: {0}]   ;;  %s362_s4 = inlined_call_operand.hbm [shape: f32[32,34], index: 4, kind: output, shape index: {1}]  }
   0x1   :  { %11 = vsyncpa [#allocation4], 0 }
   0x2   :  { %12 = vsyncpa [#allocation7], 0  ;;  %s19_s17 = sshll.u32 %s359_s1, 4  ;;  %s274_s18 = smov [#allocation2]   ;;  %s20_s17 = int_to_ptr.hbm [resolvable:$true] %s19_s17 }
   0x3   :  { %s21_s19 = sshll.u32 %s274_s18, 4  ;;  %s275_s20 = smov 128   ;;  %s22_s19 = int_to_ptr.vmem [resolvable:$true] %s21_s19 }
   0x4   :  { %s276_s21 = smov 8  }
   0x5   :  { %27 = dma.hbm_to_vmem [thread:$0]  %s20_s17, 512, %s22_s19, [#allocation3], %s275_s20, %s275_s20, %s276_s21  }
   0x6   :  { %268 = dma.done.wait [#allocation3], 512  }
   0x7   :  { %269 = vsyncadd [#allocation3], 4294966784  ;;  %v277_v0 = vmov 0   ;;  %v41_v1 = vld [vmem:[#allocation2 + $0x18] sm:$0xff]  ;;  %v40_v2 = vld [vmem:[#allocation2 + $0x10] sm:$0xff]  ;;  %vm42_vm0 = vcmask 261120   ;;  %v84_v14 = vlaneseq }
   0x8   :  { %195 = vset.pattern.permute.xlu1 %v277_v0  ;;  %194 = vset.pattern.permute.xlu0 %v277_v0  ;;  %v39_v3 = vld [vmem:[#allocation2 + $0x8] sm:$0xff]  ;;  %v38_v4 = vld [vmem:[#allocation2] sm:$0xff]  ;;  %v36_v7 = vld [vmem:[%s358_s0 + $0x10] sm:$0xff]  ;;  %vm119_vm2 = vcmask 277504   ;;  %vm128_vm3 = vcmask 273408   ;;  %s152_s13 = sshll.u32 %s362_s4, 4  ;;  %s153_s13 = int_to_ptr.hbm [resolvable:$true] %s152_s13 }
   0x9   :  { %67 = vmatpush.msra.mxu0 %v41_v1  ;;  %174 = vmatpush.msra.mxu1 %v41_v1  ;;  %v34_v5 = vld [vmem:[%s358_s0] sm:$0xff]  ;;  %v35_v6 = vld [vmem:[%s358_s0 + $0x8] sm:$0xff]  ;;  %v37_v8 = vld [vmem:[%s358_s0 + $0x18] sm:$0xff]  ;;  %v85_v16 = vand.u32 127, %v84_v14  ;;  %s279_s14 = smov [#allocation5]   ;;  %s139_s18 = sshll.u32 %s361_s3, 4  ;;  %s140_s18 = int_to_ptr.hbm [resolvable:$true] %s139_s18 }
   0xa   :  { %175 = vmatpush.msra.mxu2 %v41_v1  ;;  %176 = vmatpush.msra.mxu3 %v41_v1  ;;  %v89_v9 = vld [vmem:[%s360_s2 + $0x10] sm:$0xff]  ;;  %v87_v10 = vld [vmem:[%s360_s2] sm:$0xff]  ;;  %v90_v11 = vld [vmem:[%s360_s2 + $0x18] sm:$0xff]  ;;  %s137_s15 = sshll.u32 %s279_s14, 4  ;;  %s280_s3 = smov 64   ;;  %s138_s15 = int_to_ptr.vmem [resolvable:$true] %s137_s15 }
   0xb   :  { %68 = vmatpush.msra.mxu0 %v40_v2  ;;  %177 = vmatpush.msra.mxu1 %v40_v2  ;;  %v88_v12 = vld [vmem:[%s360_s2 + $0x8] sm:$0xff]  ;;  %vm86_vm1 = vcmp.lt.s32.totalorder %v85_v16, 32  ;;  %s278_s2 = smov [#allocation6]   ;;  %s281_s4 = smov 4  }
   0xc   :  { %178 = vmatpush.msra.mxu2 %v40_v2  ;;  %179 = vmatpush.msra.mxu3 %v40_v2  ;;  %s150_s10 = sshll.u32 %s278_s2, 4  ;;  %s151_s10 = int_to_ptr.vmem [resolvable:$true] %s150_s10 }
   0xd   :  { %69 = vmatpush.msra.mxu0 %v39_v3  ;;  %180 = vmatpush.msra.mxu1 %v39_v3 }
   0xe   :  { %181 = vmatpush.msra.mxu2 %v39_v3  ;;  %182 = vmatpush.msra.mxu3 %v39_v3 }
   0xf   :  { %70 = vmatpush.msra.mxu0 %v38_v4  ;;  %183 = vmatpush.msra.mxu1 %v38_v4 }
  0x10   :  { %184 = vmatpush.msra.mxu2 %v38_v4  ;;  %185 = vmatpush.msra.mxu3 %v38_v4 }
  0x11   :  { %170 = vmatmul.msk.f32.vlgmr.msra.gmra.mxu0 %vm42_vm0, %v34_v5  ;;  %171 = vmatmul.msk.f32.vlgmr.msra.gmra.mxu1 %vm42_vm0, %v35_v6 }
  0x12   :  { %172 = vmatmul.msk.f32.vlgmr.msra.gmra.mxu2 %vm42_vm0, %v36_v7  ;;  %173 = vmatmul.msk.f32.vlgmr.msra.gmra.mxu3 %vm42_vm0, %v37_v8 }
  0x13   :  { %103 = vperm.xlu1 %195, %v89_v9   ;;  %93 = vperm.xlu0 %194, %v87_v10  }
  0x1b   :  { %108 = vperm.xlu1 %195, %v90_v11   ;;  %98 = vperm.xlu0 %194, %v88_v12  }
  0x85   :  { %v94_v13 = vpop.permute.xlu0 %93  ;;  %v104_v15 = vpop.permute.xlu1 %103 }
  0x8d   :  { %v99_v17 = vpop.permute.xlu0 %98  ;;  %v109_v26 = vpop.permute.xlu1 %108 }
  0x8e   :  { %v72_v18 = vpop.f32.mrf.mxu0  ;;  %v75_v19 = vpop.f32.mrf.mxu1 }
  0x8f   :  { %v111_v20 = vmul.f32 %v94_v13, %v72_v18  ;;  %v112_v21 = vmul.f32 %v99_v17, %v75_v19 }
  0x91   :  { %v115_v22 = vsel %vm86_vm1, %v111_v20, %v72_v18  ;;  %v116_v23 = vsel %vm86_vm1, %v112_v21, %v75_v19 }
  0x92   :  { %120 = vst.msk [vmem:[#allocation6] sm:$0xff] %vm119_vm2, %v115_v22  ;;  %v124_v24 = vpack.c.bf16 %v115_v22, %v115_v22  ;;  %v125_v25 = vpack.c.bf16 %v116_v23, %v116_v23 }
  0x93   :  { %121 = vst.msk [vmem:[#allocation6 + $0x8] sm:$0xff] %vm119_vm2, %v116_v23 }
  0x94   :  { %129 = vst.msk [vmem:[#allocation5] sm:$0xf] %vm128_vm3, %v124_v24 }
  0x95   :  { %130 = vst.msk [vmem:[#allocation5 + $0x4] sm:$0xf] %vm128_vm3, %v125_v25  ;;  %v78_v27 = vpop.f32.mrf.mxu2  ;;  %v81_v28 = vpop.f32.mrf.mxu3 }
  0x96   :  { %v113_v29 = vmul.f32 %v104_v15, %v78_v27  ;;  %v114_v30 = vmul.f32 %v109_v26, %v81_v28 }
  0x98   :  { %v117_v31 = vsel %vm86_vm1, %v113_v29, %v78_v27  ;;  %v118_v32 = vsel %vm86_vm1, %v114_v30, %v81_v28 }
  0x99   :  { %122 = vst.msk [vmem:[#allocation6 + $0x10] sm:$0xff] %vm119_vm2, %v117_v31  ;;  %v126_v33 = vpack.c.bf16 %v117_v31, %v117_v31  ;;  %v127_v34 = vpack.c.bf16 %v118_v32, %v118_v32 }
  0x9a   :  { %123 = vst.msk [vmem:[#allocation6 + $0x18] sm:$0xff] %vm119_vm2, %v118_v32 }
  0x9b   :  { %131 = vst.msk [vmem:[#allocation5 + $0x8] sm:$0xf] %vm128_vm3, %v126_v33  ;;  %158 = dma.vmem_to_hbm [thread:$0]  %s151_s10, 512, %s153_s13, [#allocation7], %s275_s20, %s275_s20, %s276_s21  }
  0x9c   :  { %132 = vst.msk [vmem:[#allocation5 + $0xc] sm:$0xf] %vm128_vm3, %v127_v34 }
  0x9d   :  { %145 = dma.vmem_to_hbm [thread:$0]  %s138_s15, 256, %s140_s18, [#allocation4], %s280_s3, %s280_s3, %s281_s4  }
  0x9e   :  { %270 = dma.done.wait [#allocation4], 256  }
  0x9f   :  { %271 = vsyncadd [#allocation4], 4294967040 }
  0xa0   :  { %272 = dma.done.wait [#allocation7], 512  }
  0xa1   :  { %273 = vsyncadd [#allocation7], 4294966784 }
  0xa2   :  { %167 = vsyncpa [#allocation3], 1 }
  0xa3   :  { %168 = vsyncpa [#allocation4], 1 }
  0xa4   :  { %169 = vsyncpa [#allocation7], 1 }

</bundles_post_ra>
